<compile_context>
chip_gen: v7x
topology: tpu7x:2x2x1
jax: 0.10.0
libtpu: 0.0.40
codegen_flags: <defaults>
</compile_context>

<pallas_src>
import numpy as np
import jax
import jax.numpy as jnp
from jax import lax
from jax.experimental import pallas as pl
from jax.experimental.pallas import tpu as pltpu


_LANE = 128      # output-neuron tiles are multiples of the lane width
_SUBLANE = 8     # batch rows padded to a sublane multiple
_EPS = 1e-12     # torch.nn.functional.normalize eps


def _round_up(x, m):
    return (x + m - 1) // m * m


def _cosine_logits_kernel(x_ref, w_ref, o_ref):
    """o = normalize(x) @ w^T, where w rows are already unit-norm (bf16)."""
    x = x_ref[...].astype(jnp.float32)                            # (Bp, D)
    ss = jnp.sum(x * x, axis=-1, keepdims=True)
    # F.normalize: v / max(||v||, eps) == v * rsqrt(max(ss, eps^2))
    xn = x * lax.rsqrt(jnp.maximum(ss, jnp.float32(_EPS * _EPS)))
    xn = xn.astype(jnp.bfloat16)                                  # bf16 MXU inputs
    o_ref[...] = lax.dot_general(
        xn, w_ref[...],
        dimension_numbers=(((1,), (1,)), ((), ())),               # contract over D
        preferred_element_type=jnp.float32,                       # f32 accumulate
    ).astype(o_ref.dtype)


def _choose_tile_n(n_pad, d, b_pad, budget_bytes=16 << 20, max_tile=4096):
    """Largest lane-multiple N tile that keeps double-buffered W/out + x in budget."""
    per_tile_row = 2 * (d * 2) + 2 * (b_pad * 4)   # 2x bf16 W bufs + 2x f32 out bufs
    fixed = 2 * b_pad * d * 4                      # x (double-buffered, f32)
    tn = (budget_bytes - fixed) // max(per_tile_row, 1)
    tn = max(_LANE, (tn // _LANE) * _LANE)
    tn = min(tn, max_tile, n_pad)
    while n_pad % tn != 0:                         # n_pad is a 128-multiple -> terminates
        tn -= _LANE
    return tn


def cosine_logits(x2d, w_norm_bf16, *, tile_n=None):
    """x2d: (B, D) float; w_norm_bf16: (Np, D) bf16, unit-norm rows, Np % 128 == 0.

    Returns (B, Np) float32 cosine logits."""
    B, D = x2d.shape
    Np, D2 = w_norm_bf16.shape
    assert D == D2 and Np % _LANE == 0
    Bp = _round_up(max(B, 1), _SUBLANE)
    if Bp != B:
        x2d = jnp.pad(x2d, ((0, Bp - B), (0, 0)))      # zero rows -> zero logits

    if tile_n is None:
        tile_n = _choose_tile_n(Np, D, Bp)
    else:
        tile_n = min(_round_up(tile_n, _LANE), Np)
        while Np % tile_n != 0:
            tile_n -= _LANE
    grid = (Np // tile_n,)

    out = pl.pallas_call(
        _cosine_logits_kernel,
        out_shape=jax.ShapeDtypeStruct((Bp, Np), jnp.float32),
        grid_spec=pltpu.PrefetchScalarGridSpec(
            num_scalar_prefetch=0,
            grid=grid,
            in_specs=[
                pl.BlockSpec((Bp, D), lambda i: (0, 0)),        # x: small, resident
                pl.BlockSpec((tile_n, D), lambda i: (i, 0)),    # W: streamed N tiles
            ],
            out_specs=pl.BlockSpec((Bp, tile_n), lambda i: (0, i)),  # lane-dense out
        ),
        compiler_params=pltpu.CompilerParams(
            dimension_semantics=("parallel",),     # independent N tiles (2 TCs on v7x)
            vmem_limit_bytes=32 << 20,             # safe on v5e/v6e (128 MiB) & v7x (64 MiB)
        ),
    )(x2d, w_norm_bf16)
    return out[:B]


class FlatClassifier:
    """JAX port of FlatClassifier (lin_blocks=0 ECAPA Classifier head)."""

    def __init__(self, nodes_per_level, input_size, key):
        nodes_per_level = list(nodes_per_level)
        if nodes_per_level[0] != 0:
            nodes_per_level.insert(0, 0)
        self.nodes_per_level = np.cumsum(nodes_per_level, dtype=int)
        self.out_neurons = int(sum(nodes_per_level))

        # xavier_uniform_ init of the (out_neurons, input_size) weight (f32 master).
        bound = float(np.sqrt(6.0 / (self.out_neurons + input_size)))
        self.weight = jax.random.uniform(
            key, (self.out_neurons, input_size),
            minval=-bound, maxval=bound, dtype=jnp.float32)

        # Hoisted static work: row-normalize W once (f32 math), pad output-neuron
        # axis to a lane multiple with zero rows, store bf16 for MXU / half DMA.
        nrm = jnp.maximum(
            jnp.sqrt(jnp.sum(self.weight * self.weight, axis=-1, keepdims=True)),
            jnp.float32(_EPS))
        w_norm = self.weight / nrm
        n_pad = _round_up(self.out_neurons, _LANE)
        if n_pad != self.out_neurons:
            w_norm = jnp.pad(w_norm, ((0, n_pad - self.out_neurons), (0, 0)))
        self.weight_norm_bf16 = w_norm.astype(jnp.bfloat16)
        # TODO(synk): lin_blocks>0 path (Linear + BatchNorm1d stack) not implemented;
        # the speechbrain default lin_blocks=0 is reproduced exactly.

    def __call__(self, inputs, *, tile_n=None):
        # inputs: (batch, 1, emb_dim) -- matches speechbrain Classifier input
        B, T, D = inputs.shape
        x2d = inputs.reshape(B * T, D)                             # squeeze(1) glue
        logits = cosine_logits(x2d, self.weight_norm_bf16, tile_n=tile_n)
        outputs = logits.reshape(B, T, -1)                         # (B, T, Np); pad cols are 0
        cuts = self.nodes_per_level
        return tuple(outputs[:, :, int(cuts[i]):int(cuts[i + 1])]
                     for i in range(len(cuts) - 1))


if __name__ == "__main__":
    key = jax.random.PRNGKey(0)
    k_x, k_w = jax.random.split(key)

    batch, emb_dim = 4, 192                  # ECAPA-style embedding size
    nodes_per_level = [50, 90, 80]           # 220 outputs total -> padded to 256

    model = FlatClassifier(list(nodes_per_level), input_size=emb_dim, key=k_w)
    x = jax.random.normal(k_x, (batch, 1, emb_dim), dtype=jnp.float32)

    # Default auto-tiled path.
    preds = model(x)
    jax.block_until_ready(preds)
    # Also exercise the multi-tile pipelined path (grid = 2 tiles of 128).
    preds_tiled = model(x, tile_n=128)
    jax.block_until_ready(preds_tiled)

    expected = [(batch, 1, n) for n in nodes_per_level]
    assert [tuple(p.shape) for p in preds] == expected, \
        f"{[p.shape for p in preds]} != {expected}"
    assert [tuple(p.shape) for p in preds_tiled] == expected

    # Plain-JAX f32 reference for numerical check (bf16 MXU path -> loose tol).
    x2d = x.reshape(batch, emb_dim)
    xn = x2d / jnp.maximum(jnp.linalg.norm(x2d, axis=-1, keepdims=True), _EPS)
    wn = model.weight / jnp.maximum(
        jnp.linalg.norm(model.weight, axis=-1, keepdims=True), _EPS)
    ref = (xn @ wn.T)[:, None, :]

    got = jnp.concatenate(preds, axis=-1)
    got_tiled = jnp.concatenate(preds_tiled, axis=-1)
    assert jnp.allclose(got, ref, atol=3e-2), float(jnp.max(jnp.abs(got - ref)))
    assert jnp.allclose(got_tiled, got, atol=1e-6)
    assert bool(jnp.all(jnp.abs(got) <= 1.0 + 3e-2))   # cosine logits bounded

    print("KERNEL_OK")
</pallas_src>

<mosaic_0001>
module attributes {stable_mosaic.version = 11 : i64} {
  func.func @_cosine_logits_kernel(%arg0: i32, %arg1: memref<8x192xf32, #tpu.memory_space<vmem>>, %arg2: memref<256x192xbf16, #tpu.memory_space<vmem>>, %arg3: memref<8x256xf32, #tpu.memory_space<vmem>>) attributes {dimension_semantics = [#tpu.dimension_semantics<parallel>], iteration_bounds = array<i64: 1>, scalar_prefetch = 0 : i64, scratch_operands = 0 : i64, tpu.core_type = #tpu.core_type<tc>, window_params = [{pipeline_mode = #tpu.pipeline_mode<synchronous>, transform_indices = @transform_0, window_bounds = array<i64: 8, 192>}, {transform_indices = @transform_1, window_bounds = array<i64: 256, 192>}, {transform_indices = @transform_2, window_bounds = array<i64: 8, 256>}]} {
    %c0 = arith.constant 0 : index
    %c0_0 = arith.constant 0 : index
    %0 = vector.load %arg1[%c0, %c0_0] : memref<8x192xf32, #tpu.memory_space<vmem>>, vector<8x192xf32>
    %1 = arith.mulf %0, %0 : vector<8x192xf32>
    %cst = arith.constant dense<0.000000e+00> : vector<8xf32>
    %2 = vector.multi_reduction <add>, %1, %cst [1] : vector<8x192xf32> to vector<8xf32>
    %3 = vector.shape_cast %2 : vector<8xf32> to vector<8x1xf32>
    %cst_1 = arith.constant 1.000000e-24 : f32
    %4 = vector.broadcast %cst_1 : f32 to vector<8x1xf32>
    %5 = arith.maximumf %3, %4 : vector<8x1xf32>
    %6 = math.rsqrt %5 : vector<8x1xf32>
    %7 = vector.broadcast %6 : vector<8x1xf32> to vector<8x192xf32>
    %8 = arith.mulf %0, %7 : vector<8x192xf32>
    %9 = arith.truncf %8 : vector<8x192xf32> to vector<8x192xbf16>
    %c0_2 = arith.constant 0 : index
    %c0_3 = arith.constant 0 : index
    %10 = vector.load %arg2[%c0_2, %c0_3] : memref<256x192xbf16, #tpu.memory_space<vmem>>, vector<256x192xbf16>
    %cst_4 = arith.constant dense<0.000000e+00> : vector<8x256xf32>
    %11 = tpu.matmul %9, %10, %cst_4 {dimension_numbers = #tpu.dot_dimension_numbers<[1], [1], [0], [0], [0, 0, 1, 0], [], []>} : vector<8x192xbf16>, vector<256x192xbf16>, vector<8x256xf32> -> vector<8x256xf32>
    %c0_5 = arith.constant 0 : index
    %c0_6 = arith.constant 0 : index
    %12 = vector.load %arg3[%c0_5, %c0_6] : memref<8x256xf32, #tpu.memory_space<vmem>>, vector<8x256xf32>
    tpu.vector_store %arg3[%c0_5, %c0_6], %11 {strides = array<i32>} : memref<8x256xf32, #tpu.memory_space<vmem>>, vector<8x256xf32>,
    return
  }
  func.func @transform_0(%arg0: i32) -> (i32, i32) {
    %c0_i32 = arith.constant 0 : i32
    %c0_i32_0 = arith.constant 0 : i32
    %c0_i32_1 = arith.constant 0 : i32
    return %c0_i32, %c0_i32_0 : i32, i32
  }
  func.func @transform_1(%arg0: i32) -> (i32, i32) {
    %c0_i32 = arith.constant 0 : i32
    %c0_i32_0 = arith.constant 0 : i32
    return %arg0, %c0_i32 : i32, i32
  }
  func.func @transform_2(%arg0: i32) -> (i32, i32) {
    %c0_i32 = arith.constant 0 : i32
    %c0_i32_0 = arith.constant 0 : i32
    return %c0_i32, %arg0 : i32, i32
  }
}

</mosaic_0001>

<bundles_post_ra>
// kernel: tpu_custom_call.1
= control target key start
LH: loop header
LB: loop body
LE: loop exit
PB: predicated region body
PF: predicated region fallthrough
CT: control target
= control target key end

     0   :  { %vm16_vm0 = vcmask 523264   ;;  %s593_s0 = inlined_call_operand.vmem [shape: f32[8,192], index: 0, kind: input, shape index: {}]   ;;  %s594_s1 = inlined_call_operand.vmem [shape: bf16[256,192], index: 1, kind: input, shape index: {}]   ;;  %s595_s2 = inlined_call_operand.hbm [shape: f32[8,256], index: 2, kind: output, shape index: {}]  }
   0x1   :  { %v454_v0 = vld [vmem:[%s593_s0] sm:$0xff]  ;;  %v459_v1 = vld [vmem:[%s593_s0 + $0x8] sm:$0xff]  ;;  %v364_v6 = vld [vmem:[%s594_s1 + $0x14] ss:$8 sps:$4 sm:$0xff]  }
   0x2   :  { %v14_v2 = vmul.f32 %v454_v0, %v454_v0  ;;  %v15_v3 = vmul.f32 %v459_v1, %v459_v1  ;;  %v361_v4 = vld [vmem:[%s594_s1 + $0x4] ss:$8 sps:$4 sm:$0xff]   ;;  %v363_v5 = vld [vmem:[%s594_s1] ss:$8 sps:$4 sm:$0xff]   ;;  %v366_v9 = vld [vmem:[%s594_s1 + $0x10] ss:$8 sps:$4 sm:$0xff]  }
   0x3   :  { %343 = vmatprep.subr.msk.bf16.mxu0 %vm16_vm0, %v361_v4  ;;  %v367_v10 = vld [vmem:[%s594_s1 + $0x24] ss:$8 sps:$4 sm:$0xff]   ;;  %v369_v11 = vld [vmem:[%s594_s1 + $0x20] ss:$8 sps:$4 sm:$0xff]   ;;  %v370_v12 = vld [vmem:[%s594_s1 + $0x34] ss:$8 sps:$4 sm:$0xff]  }
   0x4   :  { %v17_v7 = vsel %vm16_vm0, %v15_v3, 0.0  ;;  %255 = vmatpush1.bf16.xpose.msra.mxu0 %v363_v5 }
   0x5   :  { %v18_v8 = vadd.f32 %v17_v7, %v14_v2  ;;  %344 = vmatprep.subr.msk.bf16.mxu0 %vm16_vm0, %v364_v6 }
   0x7   :  { %19 = vadd.xlane.f32.xlu0 %v18_v8 }
   0xc   :  { %257 = vmatpush1.bf16.xpose.msra.mxu0 %v366_v9 }
   0xd   :  { %345 = vmatprep.subr.msk.bf16.mxu0 %vm16_vm0, %v367_v10 }
  0x14   :  { %259 = vmatpush1.bf16.xpose.msra.mxu0 %v369_v11 }
  0x15   :  { %346 = vmatprep.subr.msk.bf16.mxu0 %vm16_vm0, %v370_v12 }
  0x16   :  { %7 = vsyncpa [#allocation3], 0  ;;  %v372_v13 = vld [vmem:[%s594_s1 + $0x30] ss:$8 sps:$4 sm:$0xff]   ;;  %v373_v14 = vld [vmem:[%s594_s1 + $0x44] ss:$8 sps:$4 sm:$0xff]  }
  0x17   :  { %v375_v15 = vld [vmem:[%s594_s1 + $0x40] ss:$8 sps:$4 sm:$0xff]   ;;  %v376_v16 = vld [vmem:[%s594_s1 + $0x54] ss:$8 sps:$4 sm:$0xff]   ;;  %v378_v17 = vld [vmem:[%s594_s1 + $0x50] ss:$8 sps:$4 sm:$0xff]  }
  0x18   :  { %v379_v18 = vld [vmem:[%s594_s1 + $0x64] ss:$8 sps:$4 sm:$0xff]   ;;  %v381_v19 = vld [vmem:[%s594_s1 + $0x60] ss:$8 sps:$4 sm:$0xff]   ;;  %v382_v20 = vld [vmem:[%s594_s1 + $0x74] ss:$8 sps:$4 sm:$0xff]  }
  0x19   :  { %v384_v21 = vld [vmem:[%s594_s1 + $0x70] ss:$8 sps:$4 sm:$0xff]   ;;  %v385_v22 = vld [vmem:[%s594_s1 + $0x84] ss:$8 sps:$4 sm:$0xff]   ;;  %v387_v23 = vld [vmem:[%s594_s1 + $0x80] ss:$8 sps:$4 sm:$0xff]  }
  0x1a   :  { %v388_v24 = vld [vmem:[%s594_s1 + $0x94] ss:$8 sps:$4 sm:$0xff]   ;;  %v390_v25 = vld [vmem:[%s594_s1 + $0x90] ss:$8 sps:$4 sm:$0xff]   ;;  %v391_v26 = vld [vmem:[%s594_s1 + $0xa4] ss:$8 sps:$4 sm:$0xff]  }
  0x1b   :  { %v393_v27 = vld [vmem:[%s594_s1 + $0xa0] ss:$8 sps:$4 sm:$0xff]   ;;  %v394_v28 = vld [vmem:[%s594_s1 + $0xb4] ss:$8 sps:$4 sm:$0xff]   ;;  %v396_v29 = vld [vmem:[%s594_s1 + $0xb0] ss:$8 sps:$4 sm:$0xff]  }
  0x1c   :  { %261 = vmatpush1.bf16.xpose.msra.mxu0 %v372_v13  ;;  %v397_v30 = vld [vmem:[%s594_s1 + $0xc4] ss:$8 sps:$4 sm:$0xff]   ;;  %v399_v31 = vld [vmem:[%s594_s1 + $0xc0] ss:$8 sps:$4 sm:$0xff]   ;;  %v400_v32 = vld [vmem:[%s594_s1 + $0xd4] ss:$8 sps:$4 sm:$0xff]  }
  0x1d   :  { %347 = vmatprep.subr.msk.bf16.mxu0 %vm16_vm0, %v373_v14  ;;  %v402_v33 = vld [vmem:[%s594_s1 + $0xd0] ss:$8 sps:$4 sm:$0xff]   ;;  %v403_v34 = vld [vmem:[%s594_s1 + $0xe4] ss:$8 sps:$4 sm:$0xff]   ;;  %v405_v35 = vld [vmem:[%s594_s1 + $0xe0] ss:$8 sps:$4 sm:$0xff]  }
  0x1e   :  { %v406_v36 = vld [vmem:[%s594_s1 + $0xf4] ss:$8 sps:$4 sm:$0xff]   ;;  %v408_v37 = vld [vmem:[%s594_s1 + $0xf0] ss:$8 sps:$4 sm:$0xff]   ;;  %s435_s0 = smov [#allocation2]  }
  0x1f   :  { %s303_s19 = sshll.u32 %s435_s0, 4  ;;  %s304_s19 = int_to_ptr.vmem [resolvable:$true] %s303_s19 }
  0x20   :  { %s411_s1 = scalar_lea.vmem %s304_s19, 256  ;;  %p416_p1 = scmp.lt.s32.totalorder %s304_s19, %s304_s19 }
  0x21   :  { %p412_p0 = scmp.ne.s32.totalorder %s304_s19, %s411_s1  ;;  %p417_p2 = scmp.lt.s32.totalorder %s411_s1, %s411_s1 }
  0x23   :  { %p418_p3 = por %p417_p2, %p416_p1 }
  0x24   :  { %263 = vmatpush1.bf16.xpose.msra.mxu0 %v375_v15 }
  0x25   :  { %348 = vmatprep.subr.msk.bf16.mxu0 %vm16_vm0, %v376_v16  ;;  %p419_p4 = pnand %p418_p3, %p412_p0 }
  0x2c   :  { %265 = vmatpush1.bf16.xpose.msra.mxu0 %v378_v17 }
  0x2d   :  { %349 = vmatprep.subr.msk.bf16.mxu0 %vm16_vm0, %v379_v18 }
  0x34   :  { %267 = vmatpush1.bf16.xpose.msra.mxu0 %v381_v19 }
  0x35   :  { %350 = vmatprep.subr.msk.bf16.mxu0 %vm16_vm0, %v382_v20 }
  0x3c   :  { %269 = vmatpush1.bf16.xpose.msra.mxu0 %v384_v21 }
  0x3d   :  { %351 = vmatprep.subr.msk.bf16.mxu0 %vm16_vm0, %v385_v22 }
  0x44   :  { %271 = vmatpush1.bf16.xpose.msra.mxu0 %v387_v23 }
  0x45   :  { %352 = vmatprep.subr.msk.bf16.mxu0 %vm16_vm0, %v388_v24 }
  0x4c   :  { %273 = vmatpush1.bf16.xpose.msra.mxu0 %v390_v25 }
  0x4d   :  { %353 = vmatprep.subr.msk.bf16.mxu0 %vm16_vm0, %v391_v26 }
  0x54   :  { %275 = vmatpush1.bf16.xpose.msra.mxu0 %v393_v27 }
  0x55   :  { %354 = vmatprep.subr.msk.bf16.mxu0 %vm16_vm0, %v394_v28 }
  0x5c   :  { %277 = vmatpush1.bf16.xpose.msra.mxu0 %v396_v29 }
  0x5d   :  { %355 = vmatprep.subr.msk.bf16.mxu0 %vm16_vm0, %v397_v30 }
  0x64   :  { %279 = vmatpush1.bf16.xpose.msra.mxu0 %v399_v31 }
  0x65   :  { %356 = vmatprep.subr.msk.bf16.mxu0 %vm16_vm0, %v400_v32 }
  0x6c   :  { %281 = vmatpush1.bf16.xpose.msra.mxu0 %v402_v33 }
  0x6d   :  { %357 = vmatprep.subr.msk.bf16.mxu0 %vm16_vm0, %v403_v34 }
  0x74   :  { %283 = vmatpush1.bf16.xpose.msra.mxu0 %v405_v35 }
  0x75   :  { %358 = vmatprep.subr.msk.bf16.mxu0 %vm16_vm0, %v406_v36 }
  0x7c   :  { %285 = vmatpush1.bf16.xpose.msra.mxu0 %v408_v37 }
  0x94   :  { %v20_v38 = vpop.xlane.xlu0 %19 }
  0x95   :  { %v21_v39 = vmax.f32 %v20_v38, 1e-24 }
  0x97   :  { %409 = vrsqrt.f32 %v21_v39 }
  0xa1   :  { %v410_v40 = vpop.eup %409 }
  0xa2   :  { %v24_v41 = vmul.f32 %v410_v40, %v459_v1  ;;  %v23_v42 = vmul.f32 %v410_v40, %v454_v0 }
  0xa4   :  { %v26_v43 = vpack.c.bf16 %v24_v41, %v24_v41  ;;  %v25_v44 = vpack.c.bf16 %v23_v42, %v23_v42 }
  0xa6   :  { %359 = vmatprep.mubr.msk.bf16.mxu0 %vm16_vm0, %v26_v43 }
  0xa7   :  { %287 = vmatmul.mubr.bf16.vlgmr.msra.gmra.mrb[0].mxu0 %v25_v44 }
 0x17a   :  { %v288_v45 = vpop.f32.mrb[0].mxu0 }
 0x17b   :  { %295 = vst [vmem:[#allocation2] sm:$0xff] %v288_v45  ;;  %v290_v46 = vpop.f32.mrb[1].mxu0 }
 0x17c   :  { %296 = vst [vmem:[#allocation2 + $0x8] sm:$0xff] %v290_v46  ;;  %v292_v47 = vpop.f32.mrb[2].mxu0 }
 0x17d   :  { %v293_v48 = vpop.f32.mrb[3].mxu0 }
 0x17e   :  { %422 = shalt.err (!%p419_p4)
}
 0x17f   :  { %s423_s22 = scalar_lea.hbm %s595_s2, 256 }
 0x180   :  { %p424_p5 = scmp.ne.s32.totalorder %s595_s2, %s423_s22  ;;  %p427_p6 = scmp.lt.u32.totalorder %s423_s22, %s595_s2 }
 0x182   :  { %p429_p7 = pnand %p427_p6, %p424_p5 }
 0x184   :  { %432 = shalt.err (!%p429_p7)
}
 0x185   :  { %306 = dma.vmem_to_hbm [thread:$0]  %s304_s19, 256, %s595_s2, [#allocation3]  }
 0x186   :  { %433 = dma.done.wait [#allocation3], 256  }
 0x187   :  { %434 = vsyncadd [#allocation3], 4294967040 }
 0x188   :  { %310 = vsyncpa [#allocation3], 1 }

</bundles_post_ra>
